<compile_context>
chip_gen: v7x
topology: tpu7x:2x2x1
jax: 0.10.0
libtpu: 0.0.40
codegen_flags: <defaults>
</compile_context>

<pallas_src>
import functools

import numpy as np
import jax
import jax.numpy as jnp
from jax.experimental import pallas as pl
from jax.experimental.pallas import tpu as pltpu

RELU_SLOPE = 0.1   # ModelS default relu_slope=0.1
LANE = 128         # lane-dense padding target


def _leaky(x, slope):
    return jnp.where(x > 0, x, slope * x)


# ----------------------------------------------------------------------------- fused kernel
def _model_s_kernel(a_ref, x_ref, inc_ref,
                    w0_ref, b0_ref, w1_ref, b1_ref, w2_ref, b2_ref,
                    nw1_ref, nb1_ref, nw2_ref, nb2_ref, nw3_ref, nb3_ref,
                    ew1_ref, eb1_ref, ew2_ref, eb2_ref, ew3_ref, eb3_ref,
                    xout_ref, node_ref, edge_ref, *, slope):
    """Whole ModelS forward (eval mode, GCN, residual=True) in one kernel.

    GCN (residual after activation, (A@X)@W ordering):
        h0 = lrelu((A @ x) @ W0 + b0)            # W0 zero-row-padded to full x width
        h1 = lrelu((A @ h0) @ W1 + b1) + h0
        xo =        (A @ h1) @ W2 + b2           # W2/b2 zero-padded to 128 lanes
    Node heads (primal+dual fused via concat-W1 / block-diag W2,W3, 128 lanes out).
    Edge heads: xij = incidence @ xo  (MXU gather: x[i]+x[j]), then fused 3-layer MLP.
    """
    f32 = jnp.float32
    a = a_ref[...]

    # --- GCN stack (activations stay in vregs) -------------------------------
    ax = jnp.dot(a, x_ref[...], preferred_element_type=f32)
    h = _leaky(jnp.dot(ax, w0_ref[...], preferred_element_type=f32) + b0_ref[...], slope)

    ah = jnp.dot(a, h, preferred_element_type=f32)
    h = _leaky(jnp.dot(ah, w1_ref[...], preferred_element_type=f32) + b1_ref[...], slope) + h

    ah2 = jnp.dot(a, h, preferred_element_type=f32)
    xo = jnp.dot(ah2, w2_ref[...], preferred_element_type=f32) + b2_ref[...]   # (N, 128)
    xout_ref[...] = xo.astype(xout_ref.dtype)

    # --- fused node heads (primal_node | dual_node) --------------------------
    nh = _leaky(jnp.dot(xo, nw1_ref[...], preferred_element_type=f32) + nb1_ref[...], slope)
    nh = _leaky(jnp.dot(nh, nw2_ref[...], preferred_element_type=f32) + nb2_ref[...], slope)
    node_ref[...] = (jnp.dot(nh, nw3_ref[...], preferred_element_type=f32)
                     + nb3_ref[...]).astype(node_ref.dtype)

    # --- edge features via incidence matmul, then fused edge heads -----------
    xij = jnp.dot(inc_ref[...], xo, preferred_element_type=f32)                # (E_pad, 128)
    eh = _leaky(jnp.dot(xij, ew1_ref[...], preferred_element_type=f32) + eb1_ref[...], slope)
    eh = _leaky(jnp.dot(eh, ew2_ref[...], preferred_element_type=f32) + eb2_ref[...], slope)
    edge_ref[...] = (jnp.dot(eh, ew3_ref[...], preferred_element_type=f32)
                     + eb3_ref[...]).astype(edge_ref.dtype)


def model_s_fused_call(a_hat, x, incidence, fp):
    n = x.shape[0]
    f_in = x.shape[1]
    e_pad = incidence.shape[0]
    h0d = fp["W0"].shape[1]
    h1d = fp["W1"].shape[1]

    flops = 2 * (n * n * f_in + n * f_in * h0d
                 + n * n * h0d + n * h0d * h1d
                 + n * n * h1d + n * h1d * LANE
                 + 3 * n * LANE * LANE
                 + e_pad * n * LANE
                 + 3 * e_pad * LANE * LANE)
    args = (a_hat, x, incidence,
            fp["W0"], fp["b0"], fp["W1"], fp["b1"], fp["W2"], fp["b2"],
            fp["NW1"], fp["NB1"], fp["NW2"], fp["NB2"], fp["NW3"], fp["NB3"],
            fp["EW1"], fp["EB1"], fp["EW2"], fp["EB2"], fp["EW3"], fp["EB3"])
    in_bytes = 4 * sum(int(np.prod(a.shape)) for a in args)
    out_bytes = 4 * (2 * n * LANE + e_pad * LANE)

    return pl.pallas_call(
        functools.partial(_model_s_kernel, slope=RELU_SLOPE),
        out_shape=(jax.ShapeDtypeStruct((n, LANE), jnp.float32),      # GCN embedding (padded)
                   jax.ShapeDtypeStruct((n, LANE), jnp.float32),      # node-head output
                   jax.ShapeDtypeStruct((e_pad, LANE), jnp.float32)), # edge-head output
        cost_estimate=pl.CostEstimate(flops=flops, transcendentals=0,
                                      bytes_accessed=in_bytes + out_bytes),
    )(*args)


# ----------------------------------------------------------------------------- one-time param prep
def preprocess_params(params):
    """Fuse + pad all weights ONCE, outside the jitted forward.

    - GCN W0 zero-row-padded to consume the full 10-feature x (cols 6:10 unused).
    - GCN W2/b2 zero-padded to 128 output lanes -> lane-dense embedding.
    - Each head pair fused: W1 = [W1a | W1b] (zero-row-padded to 128 input rows so the
      128-lane embedding is consumed directly), W2 = blockdiag, W3 = blockdiag padded to
      128 output lanes.  Output cols [:oa] = head A, [oa:oa+ob] = head B.
    """
    (w0, b0), (w1, b1), (w2, b2) = params["gcn"]
    in_full = 10                                   # raw node-feature width
    used = w0.shape[0]                             # node_feature_mode == 1 -> 6
    w0p = jnp.zeros((in_full, w0.shape[1]), jnp.float32).at[:used, :].set(w0)
    w2p = jnp.pad(w2, ((0, 0), (0, LANE - w2.shape[1])))
    b2p = jnp.pad(b2, (0, LANE - b2.shape[0]))

    def fuse_heads(head_a, head_b):
        (w1a, b1a), (w2a, b2a), (w3a, b3a) = head_a
        (w1b, b1b), (w2b, b2b), (w3b, b3b) = head_b
        din = w1a.shape[0]
        ha, hb = w1a.shape[1], w1b.shape[1]
        oa, ob = w3a.shape[1], w3b.shape[1]
        W1 = jnp.zeros((LANE, ha + hb), jnp.float32)
        W1 = W1.at[:din, :ha].set(w1a).at[:din, ha:].set(w1b)
        B1 = jnp.concatenate([b1a, b1b], 0)
        W2 = jnp.zeros((ha + hb, ha + hb), jnp.float32)
        W2 = W2.at[:ha, :ha].set(w2a).at[ha:, ha:].set(w2b)
        B2 = jnp.concatenate([b2a, b2b], 0)
        W3 = jnp.zeros((ha + hb, LANE), jnp.float32)
        W3 = W3.at[:ha, :oa].set(w3a).at[ha:, oa:oa + ob].set(w3b)
        B3 = jnp.zeros((LANE,), jnp.float32).at[:oa].set(b3a).at[oa:oa + ob].set(b3b)
        return (W1, B1.reshape(1, -1), W2, B2.reshape(1, -1), W3, B3.reshape(1, -1)), oa, ob

    (NW1, NB1, NW2, NB2, NW3, NB3), n_oa, n_ob = fuse_heads(params["primal_node"],
                                                            params["dual_node"])
    (EW1, EB1, EW2, EB2, EW3, EB3), e_oa, e_ob = fuse_heads(params["primal_edge"],
                                                            params["dual_edge"])

    fp = dict(W0=w0p, b0=b0.reshape(1, -1),
              W1=w1, b1=b1.reshape(1, -1),
              W2=w2p, b2=b2p.reshape(1, -1),
              NW1=NW1, NB1=NB1, NW2=NW2, NB2=NB2, NW3=NW3, NB3=NB3,
              EW1=EW1, EB1=EB1, EW2=EW2, EB2=EB2, EW3=EW3, EB3=EB3)
    dims = (int(w2.shape[1]), int(n_oa), int(n_ob), int(e_oa), int(e_ob))
    return jax.device_put(fp), dims


def build_incidence(ud_edges_list, ptr, num_nodes):
    """Dense 0/1 (E_pad, N) incidence matrix: row e has 1s at the two endpoints of edge e
    (with the per-graph node offset), so incidence @ x_out == x_out[i] + x_out[j].
    Rows padded to a multiple of 8 (f32 sublane granularity) with zeros."""
    e_counts = tuple(int(ud.shape[0]) for ud in ud_edges_list)
    e_total = sum(e_counts)
    e_pad = max(8, ((e_total + 7) // 8) * 8)
    inc = np.zeros((e_pad, num_nodes), np.float32)
    row = 0
    for k, ud in enumerate(ud_edges_list):
        base = int(ptr[k])
        udn = np.asarray(ud)
        for e in range(udn.shape[0]):
            inc[row, base + int(udn[e, 0])] += 1.0
            inc[row, base + int(udn[e, 1])] += 1.0
            row += 1
    return jnp.asarray(inc), e_counts


# ----------------------------------------------------------------------------- glue (plain JAX)
_SMAT_IDX = np.array([0, 1, 2, 3, 1, 4, 5, 6, 2, 5, 7, 8, 3, 6, 8, 9], dtype=np.int64)
# one-hot (10, 16) scatter matrix: v @ P lays out the symmetric 4x4 block row-major
_SMAT_P = jnp.asarray((np.arange(10)[:, None] == _SMAT_IDX[None, :]).astype(np.float32))


def smat_batch(v):  # (..., 10) -> (..., 4, 4) symmetric block, via tiny matmul (no gather)
    return jnp.matmul(v, _SMAT_P).reshape(v.shape[:-1] + (4, 4))


def recover_X(vp, ep, edge_map):
    n = vp.shape[0]
    off_vals = ep[edge_map]                                   # (N, N, 10)
    eye = jnp.eye(n, dtype=bool)
    vals = jnp.where(eye[:, :, None], vp[:, None, :], off_vals)
    blocks = smat_batch(vals)                                 # (N, N, 4, 4)
    return blocks.transpose(0, 2, 1, 3).reshape(4 * n, 4 * n)


def recover_S(vd, ed, edge_map):
    n = vd.shape[0]
    off = ed[edge_map].reshape(n, n, 4, 4)                    # mat(ed, 4)
    lower = (jnp.arange(n)[:, None] > jnp.arange(n)[None, :])[:, :, None, None]
    off = jnp.where(lower, jnp.swapaxes(off, -1, -2), off)    # transpose below diagonal
    diag = smat_batch(vd)                                     # (N, 4, 4)
    eye = jnp.eye(n, dtype=bool)[:, :, None, None]
    blocks = jnp.where(eye, diag[:, None], off)
    return blocks.transpose(0, 2, 1, 3).reshape(4 * n, 4 * n)


def normalized_adjacency(edge_index, num_nodes):
    src, dst = edge_index[0], edge_index[1]
    a = jnp.zeros((num_nodes, num_nodes), jnp.float32).at[dst, src].set(1.0)
    deg = a.sum(axis=1)
    dis = jnp.where(deg > 0, 1.0 / jnp.sqrt(jnp.maximum(deg, 1e-12)), 0.0)
    return dis[:, None] * a * dis[None, :]


def init_linear(key, d_in, d_out):
    kw, kb = jax.random.split(key)
    w = jax.random.normal(kw, (d_in, d_out), jnp.float32) * 0.1
    b = jax.random.normal(kb, (d_out,), jnp.float32) * 0.1
    return w, b


# ----------------------------------------------------------------------------- forward (jitted)
@functools.partial(jax.jit, static_argnums=(5, 6, 7))
def model_s_forward(x, edge_index, incidence, edge_maps, fused_params,
                    ptr, edge_counts, dims):
    """ModelS.forward (eval mode, GCN, residual=True, dual_edge_mlp_output_dim=16)."""
    num_nodes = x.shape[0]
    num_graphs = len(ptr) - 1
    gcn_out, n_oa, n_ob, e_oa, e_ob = dims

    a_hat = normalized_adjacency(edge_index, num_nodes)

    # --- single fused Pallas kernel: GCN stack + node heads + edge heads ------
    x_pad, node_out, edge_out = model_s_fused_call(a_hat, x, incidence, fused_params)

    x_out = x_pad[:, :gcn_out]                                # (N_total, 64)
    vp_all = node_out[:, :n_oa]                               # (N_total, 10)
    vd_all = node_out[:, n_oa:n_oa + n_ob]                    # (N_total, 10)
    ep_all = edge_out[:, :e_oa]                               # (E_pad, 10) (pad rows unused)
    ed_all = edge_out[:, e_oa:e_oa + e_ob]                    # (E_pad, 16)

    # --- per-graph block-matrix recovery (plain JAX, fused by XLA under jit) --
    X_list, S_list, Aty_list = [], [], []
    e_off = 0
    for k in range(num_graphs):
        ns, ne = ptr[k], ptr[k + 1]
        ec = edge_counts[k]
        vp, vd = vp_all[ns:ne], vd_all[ns:ne]
        ep, ed = ep_all[e_off:e_off + ec], ed_all[e_off:e_off + ec]
        e_off += ec
        em = edge_maps[k]
        X_list.append(recover_X(vp, ep, em))
        S_list.append(recover_S(vd, ed, em))
        Aty_list.append(None)                                 # dual_edge_mlp_output_dim == 16
    return x_out, X_list, S_list, Aty_list


# ----------------------------------------------------------------------------- main
if __name__ == "__main__":
    key = jax.random.PRNGKey(0)
    keys = jax.random.split(key, 16)

    # Two fully-connected graphs of 4 nodes each (8 nodes total), 10 raw features per node.
    nodes_per_graph, num_graphs = 4, 2
    n_total = nodes_per_graph * num_graphs
    x = jax.random.normal(keys[0], (n_total, 10), jnp.float32)

    ud = np.array([[0, 1], [0, 2], [0, 3], [1, 2], [1, 3], [2, 3]], np.int32)
    edge_map = jnp.array([[0, 0, 1, 2],
                          [0, 0, 3, 4],
                          [1, 3, 0, 5],
                          [2, 4, 5, 0]], jnp.int32)
    ud_edges_list = (ud, ud)
    edge_maps = (edge_map, edge_map)

    src, dst = [], []
    for g in range(num_graphs):
        off = g * nodes_per_graph
        for i, j in [(0, 1), (0, 2), (0, 3), (1, 2), (1, 3), (2, 3)]:
            src += [off + i, off + j]
            dst += [off + j, off + i]
    edge_index = jnp.array([src, dst], jnp.int32)             # (2, 24)
    ptr = (0, 4, 8)                                           # static graph boundaries

    # Deterministic parameter init (shapes from ModelS.__init__ defaults).
    params = {
        "gcn": [init_linear(keys[1], 6, 32),
                init_linear(keys[2], 32, 32),
                init_linear(keys[3], 32, 64)],
        "primal_node": [init_linear(keys[4], 64, 64),
                        init_linear(keys[5], 64, 64),
                        init_linear(keys[6], 64, 10)],
        "dual_node": [init_linear(keys[7], 64, 64),
                      init_linear(keys[8], 64, 64),
                      init_linear(keys[9], 64, 10)],
        "primal_edge": [init_linear(keys[10], 64, 64),
                        init_linear(keys[11], 64, 64),
                        init_linear(keys[12], 64, 10)],
        "dual_edge": [init_linear(keys[13], 64, 64),
                      init_linear(keys[14], 64, 64),
                      init_linear(keys[15], 64, 16)],
    }

    # One-time preprocessing (hoisted out of the jitted forward).
    fused_params, dims = preprocess_params(params)
    incidence, edge_counts = build_incidence(ud_edges_list, ptr, n_total)

    x_out, X_list, S_list, Aty_list = model_s_forward(
        x, edge_index, incidence, edge_maps, fused_params, ptr, edge_counts, dims)

    jax.block_until_ready(x_out)
    for Xk, Sk in zip(X_list, S_list):
        jax.block_until_ready(Xk)
        jax.block_until_ready(Sk)

    assert x_out.shape == (8, 64)
    assert all(Xk.shape == (16, 16) for Xk in X_list)
    assert all(Sk.shape == (16, 16) for Sk in S_list)
    assert all(a is None for a in Aty_list)
    print("KERNEL_OK")
</pallas_src>

<mosaic_0001>
module attributes {stable_mosaic.version = 11 : i64} {
  func.func @_model_s_kernel(%arg0: memref<8x8xf32, #tpu.memory_space<vmem>>, %arg1: memref<8x10xf32, #tpu.memory_space<vmem>>, %arg2: memref<16x8xf32, #tpu.memory_space<vmem>>, %arg3: memref<10x32xf32, #tpu.memory_space<vmem>>, %arg4: memref<1x32xf32, #tpu.memory_space<vmem>>, %arg5: memref<32x32xf32, #tpu.memory_space<vmem>>, %arg6: memref<1x32xf32, #tpu.memory_space<vmem>>, %arg7: memref<32x128xf32, #tpu.memory_space<vmem>>, %arg8: memref<1x128xf32, #tpu.memory_space<vmem>>, %arg9: memref<128x128xf32, #tpu.memory_space<vmem>>, %arg10: memref<1x128xf32, #tpu.memory_space<vmem>>, %arg11: memref<128x128xf32, #tpu.memory_space<vmem>>, %arg12: memref<1x128xf32, #tpu.memory_space<vmem>>, %arg13: memref<128x128xf32, #tpu.memory_space<vmem>>, %arg14: memref<1x128xf32, #tpu.memory_space<vmem>>, %arg15: memref<128x128xf32, #tpu.memory_space<vmem>>, %arg16: memref<1x128xf32, #tpu.memory_space<vmem>>, %arg17: memref<128x128xf32, #tpu.memory_space<vmem>>, %arg18: memref<1x128xf32, #tpu.memory_space<vmem>>, %arg19: memref<128x128xf32, #tpu.memory_space<vmem>>, %arg20: memref<1x128xf32, #tpu.memory_space<vmem>>, %arg21: memref<8x128xf32, #tpu.memory_space<vmem>>, %arg22: memref<8x128xf32, #tpu.memory_space<vmem>>, %arg23: memref<16x128xf32, #tpu.memory_space<vmem>>) attributes {dimension_semantics = [], scalar_prefetch = 0 : i64, scratch_operands = 0 : i64, tpu.core_type = #tpu.core_type<tc>} {
    %c0 = arith.constant 0 : index
    %c0_0 = arith.constant 0 : index
    %0 = vector.load %arg0[%c0, %c0_0] : memref<8x8xf32, #tpu.memory_space<vmem>>, vector<8x8xf32>
    %c0_1 = arith.constant 0 : index
    %c0_2 = arith.constant 0 : index
    %1 = vector.load %arg1[%c0_1, %c0_2] : memref<8x10xf32, #tpu.memory_space<vmem>>, vector<8x10xf32>
    %cst = arith.constant dense<0.000000e+00> : vector<8x10xf32>
    %2 = tpu.matmul %0, %1, %cst {dimension_numbers = #tpu.dot_dimension_numbers<[1], [0], [0], [1], [0, 0, 1, 1], [], []>} : vector<8x8xf32>, vector<8x10xf32>, vector<8x10xf32> -> vector<8x10xf32>
    %c0_3 = arith.constant 0 : index
    %c0_4 = arith.constant 0 : index
    %3 = vector.load %arg3[%c0_3, %c0_4] : memref<10x32xf32, #tpu.memory_space<vmem>>, vector<10x32xf32>
    %cst_5 = arith.constant dense<0.000000e+00> : vector<8x32xf32>
    %4 = tpu.matmul %2, %3, %cst_5 {dimension_numbers = #tpu.dot_dimension_numbers<[1], [0], [0], [1], [0, 0, 1, 1], [], []>} : vector<8x10xf32>, vector<10x32xf32>, vector<8x32xf32> -> vector<8x32xf32>
    %c0_6 = arith.constant 0 : index
    %c0_7 = arith.constant 0 : index
    %5 = vector.load %arg4[%c0_6, %c0_7] : memref<1x32xf32, #tpu.memory_space<vmem>>, vector<1x32xf32>
    %6 = vector.broadcast %5 : vector<1x32xf32> to vector<8x32xf32>
    %7 = arith.addf %4, %6 : vector<8x32xf32>
    %cst_8 = arith.constant 0.000000e+00 : f32
    %8 = vector.broadcast %cst_8 : f32 to vector<8x32xf32>
    %9 = arith.cmpf ogt, %7, %8 : vector<8x32xf32>
    %cst_9 = arith.constant 1.000000e-01 : f32
    %10 = vector.broadcast %cst_9 : f32 to vector<8x32xf32>
    %11 = arith.mulf %10, %7 : vector<8x32xf32>
    %12 = arith.select %9, %7, %11 : vector<8x32xi1>, vector<8x32xf32>
    %cst_10 = arith.constant dense<0.000000e+00> : vector<8x32xf32>
    %13 = tpu.matmul %0, %12, %cst_10 {dimension_numbers = #tpu.dot_dimension_numbers<[1], [0], [0], [1], [0, 0, 1, 1], [], []>} : vector<8x8xf32>, vector<8x32xf32>, vector<8x32xf32> -> vector<8x32xf32>
    %c0_11 = arith.constant 0 : index
    %c0_12 = arith.constant 0 : index
    %14 = vector.load %arg5[%c0_11, %c0_12] : memref<32x32xf32, #tpu.memory_space<vmem>>, vector<32x32xf32>
    %cst_13 = arith.constant dense<0.000000e+00> : vector<8x32xf32>
    %15 = tpu.matmul %13, %14, %cst_13 {dimension_numbers = #tpu.dot_dimension_numbers<[1], [0], [0], [1], [0, 0, 1, 1], [], []>} : vector<8x32xf32>, vector<32x32xf32>, vector<8x32xf32> -> vector<8x32xf32>
    %c0_14 = arith.constant 0 : index
    %c0_15 = arith.constant 0 : index
    %16 = vector.load %arg6[%c0_14, %c0_15] : memref<1x32xf32, #tpu.memory_space<vmem>>, vector<1x32xf32>
    %17 = vector.broadcast %16 : vector<1x32xf32> to vector<8x32xf32>
    %18 = arith.addf %15, %17 : vector<8x32xf32>
    %cst_16 = arith.constant 0.000000e+00 : f32
    %19 = vector.broadcast %cst_16 : f32 to vector<8x32xf32>
    %20 = arith.cmpf ogt, %18, %19 : vector<8x32xf32>
    %cst_17 = arith.constant 1.000000e-01 : f32
    %21 = vector.broadcast %cst_17 : f32 to vector<8x32xf32>
    %22 = arith.mulf %21, %18 : vector<8x32xf32>
    %23 = arith.select %20, %18, %22 : vector<8x32xi1>, vector<8x32xf32>
    %24 = arith.addf %23, %12 : vector<8x32xf32>
    %cst_18 = arith.constant dense<0.000000e+00> : vector<8x32xf32>
    %25 = tpu.matmul %0, %24, %cst_18 {dimension_numbers = #tpu.dot_dimension_numbers<[1], [0], [0], [1], [0, 0, 1, 1], [], []>} : vector<8x8xf32>, vector<8x32xf32>, vector<8x32xf32> -> vector<8x32xf32>
    %c0_19 = arith.constant 0 : index
    %c0_20 = arith.constant 0 : index
    %26 = vector.load %arg7[%c0_19, %c0_20] : memref<32x128xf32, #tpu.memory_space<vmem>>, vector<32x128xf32>
    %cst_21 = arith.constant dense<0.000000e+00> : vector<8x128xf32>
    %27 = tpu.matmul %25, %26, %cst_21 {dimension_numbers = #tpu.dot_dimension_numbers<[1], [0], [0], [1], [0, 0, 1, 1], [], []>} : vector<8x32xf32>, vector<32x128xf32>, vector<8x128xf32> -> vector<8x128xf32>
    %c0_22 = arith.constant 0 : index
    %c0_23 = arith.constant 0 : index
    %28 = vector.load %arg8[%c0_22, %c0_23] : memref<1x128xf32, #tpu.memory_space<vmem>>, vector<1x128xf32>
    %29 = vector.broadcast %28 : vector<1x128xf32> to vector<8x128xf32>
    %30 = arith.addf %27, %29 : vector<8x128xf32>
    %c0_24 = arith.constant 0 : index
    %c0_25 = arith.constant 0 : index
    %31 = vector.load %arg21[%c0_24, %c0_25] : memref<8x128xf32, #tpu.memory_space<vmem>>, vector<8x128xf32>
    tpu.vector_store %arg21[%c0_24, %c0_25], %30 {strides = array<i32>} : memref<8x128xf32, #tpu.memory_space<vmem>>, vector<8x128xf32>,
    %c0_26 = arith.constant 0 : index
    %c0_27 = arith.constant 0 : index
    %32 = vector.load %arg9[%c0_26, %c0_27] : memref<128x128xf32, #tpu.memory_space<vmem>>, vector<128x128xf32>
    %cst_28 = arith.constant dense<0.000000e+00> : vector<8x128xf32>
    %33 = tpu.matmul %30, %32, %cst_28 {dimension_numbers = #tpu.dot_dimension_numbers<[1], [0], [0], [1], [0, 0, 1, 1], [], []>} : vector<8x128xf32>, vector<128x128xf32>, vector<8x128xf32> -> vector<8x128xf32>
    %c0_29 = arith.constant 0 : index
    %c0_30 = arith.constant 0 : index
    %34 = vector.load %arg10[%c0_29, %c0_30] : memref<1x128xf32, #tpu.memory_space<vmem>>, vector<1x128xf32>
    %35 = vector.broadcast %34 : vector<1x128xf32> to vector<8x128xf32>
    %36 = arith.addf %33, %35 : vector<8x128xf32>
    %cst_31 = arith.constant 0.000000e+00 : f32
    %37 = vector.broadcast %cst_31 : f32 to vector<8x128xf32>
    %38 = arith.cmpf ogt, %36, %37 : vector<8x128xf32>
    %cst_32 = arith.constant 1.000000e-01 : f32
    %39 = vector.broadcast %cst_32 : f32 to vector<8x128xf32>
    %40 = arith.mulf %39, %36 : vector<8x128xf32>
    %41 = arith.select %38, %36, %40 : vector<8x128xi1>, vector<8x128xf32>
    %c0_33 = arith.constant 0 : index
    %c0_34 = arith.constant 0 : index
    %42 = vector.load %arg11[%c0_33, %c0_34] : memref<128x128xf32, #tpu.memory_space<vmem>>, vector<128x128xf32>
    %cst_35 = arith.constant dense<0.000000e+00> : vector<8x128xf32>
    %43 = tpu.matmul %41, %42, %cst_35 {dimension_numbers = #tpu.dot_dimension_numbers<[1], [0], [0], [1], [0, 0, 1, 1], [], []>} : vector<8x128xf32>, vector<128x128xf32>, vector<8x128xf32> -> vector<8x128xf32>
    %c0_36 = arith.constant 0 : index
    %c0_37 = arith.constant 0 : index
    %44 = vector.load %arg12[%c0_36, %c0_37] : memref<1x128xf32, #tpu.memory_space<vmem>>, vector<1x128xf32>
    %45 = vector.broadcast %44 : vector<1x128xf32> to vector<8x128xf32>
    %46 = arith.addf %43, %45 : vector<8x128xf32>
    %cst_38 = arith.constant 0.000000e+00 : f32
    %47 = vector.broadcast %cst_38 : f32 to vector<8x128xf32>
    %48 = arith.cmpf ogt, %46, %47 : vector<8x128xf32>
    %cst_39 = arith.constant 1.000000e-01 : f32
    %49 = vector.broadcast %cst_39 : f32 to vector<8x128xf32>
    %50 = arith.mulf %49, %46 : vector<8x128xf32>
    %51 = arith.select %48, %46, %50 : vector<8x128xi1>, vector<8x128xf32>
    %c0_40 = arith.constant 0 : index
    %c0_41 = arith.constant 0 : index
    %52 = vector.load %arg13[%c0_40, %c0_41] : memref<128x128xf32, #tpu.memory_space<vmem>>, vector<128x128xf32>
    %cst_42 = arith.constant dense<0.000000e+00> : vector<8x128xf32>
    %53 = tpu.matmul %51, %52, %cst_42 {dimension_numbers = #tpu.dot_dimension_numbers<[1], [0], [0], [1], [0, 0, 1, 1], [], []>} : vector<8x128xf32>, vector<128x128xf32>, vector<8x128xf32> -> vector<8x128xf32>
    %c0_43 = arith.constant 0 : index
    %c0_44 = arith.constant 0 : index
    %54 = vector.load %arg14[%c0_43, %c0_44] : memref<1x128xf32, #tpu.memory_space<vmem>>, vector<1x128xf32>
    %55 = vector.broadcast %54 : vector<1x128xf32> to vector<8x128xf32>
    %56 = arith.addf %53, %55 : vector<8x128xf32>
    %c0_45 = arith.constant 0 : index
    %c0_46 = arith.constant 0 : index
    %57 = vector.load %arg22[%c0_45, %c0_46] : memref<8x128xf32, #tpu.memory_space<vmem>>, vector<8x128xf32>
    tpu.vector_store %arg22[%c0_45, %c0_46], %56 {strides = array<i32>} : memref<8x128xf32, #tpu.memory_space<vmem>>, vector<8x128xf32>,
    %c0_47 = arith.constant 0 : index
    %c0_48 = arith.constant 0 : index
    %58 = vector.load %arg2[%c0_47, %c0_48] : memref<16x8xf32, #tpu.memory_space<vmem>>, vector<16x8xf32>
    %cst_49 = arith.constant dense<0.000000e+00> : vector<16x128xf32>
    %59 = tpu.matmul %58, %30, %cst_49 {dimension_numbers = #tpu.dot_dimension_numbers<[1], [0], [0], [1], [0, 0, 1, 1], [], []>} : vector<16x8xf32>, vector<8x128xf32>, vector<16x128xf32> -> vector<16x128xf32>
    %c0_50 = arith.constant 0 : index
    %c0_51 = arith.constant 0 : index
    %60 = vector.load %arg15[%c0_50, %c0_51] : memref<128x128xf32, #tpu.memory_space<vmem>>, vector<128x128xf32>
    %cst_52 = arith.constant dense<0.000000e+00> : vector<16x128xf32>
    %61 = tpu.matmul %59, %60, %cst_52 {dimension_numbers = #tpu.dot_dimension_numbers<[1], [0], [0], [1], [0, 0, 1, 1], [], []>} : vector<16x128xf32>, vector<128x128xf32>, vector<16x128xf32> -> vector<16x128xf32>
    %c0_53 = arith.constant 0 : index
    %c0_54 = arith.constant 0 : index
    %62 = vector.load %arg16[%c0_53, %c0_54] : memref<1x128xf32, #tpu.memory_space<vmem>>, vector<1x128xf32>
    %63 = vector.broadcast %62 : vector<1x128xf32> to vector<16x128xf32>
    %64 = arith.addf %61, %63 : vector<16x128xf32>
    %cst_55 = arith.constant 0.000000e+00 : f32
    %65 = vector.broadcast %cst_55 : f32 to vector<16x128xf32>
    %66 = arith.cmpf ogt, %64, %65 : vector<16x128xf32>
    %cst_56 = arith.constant 1.000000e-01 : f32
    %67 = vector.broadcast %cst_56 : f32 to vector<16x128xf32>
    %68 = arith.mulf %67, %64 : vector<16x128xf32>
    %69 = arith.select %66, %64, %68 : vector<16x128xi1>, vector<16x128xf32>
    %c0_57 = arith.constant 0 : index
    %c0_58 = arith.constant 0 : index
    %70 = vector.load %arg17[%c0_57, %c0_58] : memref<128x128xf32, #tpu.memory_space<vmem>>, vector<128x128xf32>
    %cst_59 = arith.constant dense<0.000000e+00> : vector<16x128xf32>
    %71 = tpu.matmul %69, %70, %cst_59 {dimension_numbers = #tpu.dot_dimension_numbers<[1], [0], [0], [1], [0, 0, 1, 1], [], []>} : vector<16x128xf32>, vector<128x128xf32>, vector<16x128xf32> -> vector<16x128xf32>
    %c0_60 = arith.constant 0 : index
    %c0_61 = arith.constant 0 : index
    %72 = vector.load %arg18[%c0_60, %c0_61] : memref<1x128xf32, #tpu.memory_space<vmem>>, vector<1x128xf32>
    %73 = vector.broadcast %72 : vector<1x128xf32> to vector<16x128xf32>
    %74 = arith.addf %71, %73 : vector<16x128xf32>
    %cst_62 = arith.constant 0.000000e+00 : f32
    %75 = vector.broadcast %cst_62 : f32 to vector<16x128xf32>
    %76 = arith.cmpf ogt, %74, %75 : vector<16x128xf32>
    %cst_63 = arith.constant 1.000000e-01 : f32
    %77 = vector.broadcast %cst_63 : f32 to vector<16x128xf32>
    %78 = arith.mulf %77, %74 : vector<16x128xf32>
    %79 = arith.select %76, %74, %78 : vector<16x128xi1>, vector<16x128xf32>
    %c0_64 = arith.constant 0 : index
    %c0_65 = arith.constant 0 : index
    %80 = vector.load %arg19[%c0_64, %c0_65] : memref<128x128xf32, #tpu.memory_space<vmem>>, vector<128x128xf32>
    %cst_66 = arith.constant dense<0.000000e+00> : vector<16x128xf32>
    %81 = tpu.matmul %79, %80, %cst_66 {dimension_numbers = #tpu.dot_dimension_numbers<[1], [0], [0], [1], [0, 0, 1, 1], [], []>} : vector<16x128xf32>, vector<128x128xf32>, vector<16x128xf32> -> vector<16x128xf32>
    %c0_67 = arith.constant 0 : index
    %c0_68 = arith.constant 0 : index
    %82 = vector.load %arg20[%c0_67, %c0_68] : memref<1x128xf32, #tpu.memory_space<vmem>>, vector<1x128xf32>
    %83 = vector.broadcast %82 : vector<1x128xf32> to vector<16x128xf32>
    %84 = arith.addf %81, %83 : vector<16x128xf32>
    %c0_69 = arith.constant 0 : index
    %c0_70 = arith.constant 0 : index
    %85 = vector.load %arg23[%c0_69, %c0_70] : memref<16x128xf32, #tpu.memory_space<vmem>>, vector<16x128xf32>
    tpu.vector_store %arg23[%c0_69, %c0_70], %84 {strides = array<i32>} : memref<16x128xf32, #tpu.memory_space<vmem>>, vector<16x128xf32>,
    return
  }
}

</mosaic_0001>

<bundles_post_ra>
// kernel: model_s_forward.1
= control target key start
LH: loop header
LB: loop body
LE: loop exit
PB: predicated region body
PF: predicated region fallthrough
CT: control target
= control target key end

     0   :  { %s2433_s0 = inlined_call_operand.vmem [shape: f32[8,8], index: 0, kind: input, shape index: {}]   ;;  %s2434_s1 = inlined_call_operand.vmem [shape: f32[8,10], index: 1, kind: input, shape index: {}]   ;;  %s2435_s2 = inlined_call_operand.vmem [shape: f32[16,8], index: 2, kind: input, shape index: {}]   ;;  %s2436_s3 = inlined_call_operand.vmem [shape: f32[10,32], index: 3, kind: input, shape index: {}]   ;;  %s2437_s4 = inlined_call_operand.vmem [shape: f32[1,32], index: 4, kind: input, shape index: {}]   ;;  %s2438_s5 = inlined_call_operand.vmem [shape: f32[32,32], index: 5, kind: input, shape index: {}]   ;;  %s2439_s6 = inlined_call_operand.vmem [shape: f32[1,32], index: 6, kind: input, shape index: {}]   ;;  %s2440_s7 = inlined_call_operand.vmem [shape: f32[32,128], index: 7, kind: input, shape index: {}]   ;;  %s2441_s8 = inlined_call_operand.vmem [shape: f32[1,128], index: 8, kind: input, shape index: {}]   ;;  %s2442_s9 = inlined_call_operand.vmem [shape: f32[128,128], index: 9, kind: input, shape index: {}]   ;;  %s2443_s10 = inlined_call_operand.vmem [shape: f32[1,128], index: 10, kind: input, shape index: {}]   ;;  %s2444_s11 = inlined_call_operand.vmem [shape: f32[128,128], index: 11, kind: input, shape index: {}]   ;;  %s2445_s12 = inlined_call_operand.vmem [shape: f32[1,128], index: 12, kind: input, shape index: {}]   ;;  %s2446_s13 = inlined_call_operand.vmem [shape: f32[128,128], index: 13, kind: input, shape index: {}]   ;;  %s2447_s14 = inlined_call_operand.vmem [shape: f32[1,128], index: 14, kind: input, shape index: {}]   ;;  %s2448_s15 = inlined_call_operand.vmem [shape: f32[128,128], index: 15, kind: input, shape index: {}]   ;;  %s2449_s16 = inlined_call_operand.vmem [shape: f32[1,128], index: 16, kind: input, shape index: {}]   ;;  %s2450_s17 = inlined_call_operand.vmem [shape: f32[128,128], index: 17, kind: input, shape index: {}]   ;;  %s2451_s18 = inlined_call_operand.vmem [shape: f32[1,128], index: 18, kind: input, shape index: {}]   ;;  %s2452_s19 = inlined_call_operand.vmem [shape: f32[128,128], index: 19, kind: input, shape index: {}]   ;;  %s2453_s20 = inlined_call_operand.vmem [shape: f32[1,128], index: 20, kind: input, shape index: {}]   ;;  %s2454_s21 = inlined_call_operand.hbm [shape: f32[8,128], index: 21, kind: output, shape index: {0}]   ;;  %s2455_s22 = inlined_call_operand.vmem [shape: f32[8,128], index: 22, kind: output, shape index: {1}]   ;;  %s2456_s23 = inlined_call_operand.vmem [shape: f32[16,128], index: 23, kind: output, shape index: {2}]  }
   0x1   :  { %2461 = sst [smem:[#allocation5_spill]] %s2433_s0 }
   0x2   :  { %2462 = sst [smem:[#allocation6_spill]] %s2434_s1 }
   0x3   :  { %2463 = sst [smem:[#allocation7_spill]] %s2435_s2 }
   0x4   :  { %2464 = sst [smem:[#allocation8_spill]] %s2436_s3 }
   0x5   :  { %2465 = sst [smem:[#allocation9_spill]] %s2437_s4 }
   0x6   :  { %2466 = sst [smem:[#allocation10_spill]] %s2438_s5 }
   0x7   :  { %2467 = sst [smem:[#allocation11_spill]] %s2439_s6 }
   0x8   :  { %2468 = sst [smem:[#allocation12_spill]] %s2440_s7 }
   0x9   :  { %2469 = sst [smem:[#allocation13_spill]] %s2451_s18 }
   0xa   :  { %s2470_s24 = sld [smem:[#allocation6_spill]]  ;;  %s2471_s18 = sld [smem:[#allocation5_spill]]  ;;  %vm74_vm0 = vcmask 64512   ;;  %v1868_v2 = vmov 0.0   ;;  %vm1869_vm1 = vmmov 0   ;;  %vm161_vm2 = vcmask 1041408  }
   0xb   :  { %1396 = vmatprep.subr.mxu1 %v1868_v2  ;;  %1398 = vmatprep.mubr.msk.f32.mxu1 %vm1869_vm1, %v1868_v2  ;;  %s2472_s2 = sld [smem:[#allocation8_spill]]  ;;  %vm1870_vm3 = vmmov 1   ;;  %v1871_v6 = vmov 0.0|0.0  }
   0xc   :  { %vm1657_vm4 = vmpackc.low %vm161_vm2, %vm1870_vm3  ;;  %1408 = vmatprep.subr.mxu0 %v1868_v2 }
  0x10   :  { %v73_v0 = vld [vmem:[%s2470_s24] sm:$0xff] }
  0x11   :  { %v1999_v1 = vld [vmem:[%s2471_s18] sm:$0xff]  ;;  %v149_v4 = vld [vmem:[%s2472_s2 + $0x8] sm:$0x3]  ;;  %1397 = vmatpush3.msra.mxu1 %v73_v0 }
  0x12   :  { %v148_v3 = vld [vmem:[%s2472_s2] sm:$0xff]  ;;  %1399 = vmatmul.mubr.msk.f32.vlgmr.msra.gmra.mrb[0].mxu1 %vm74_vm0, %v1999_v1  ;;  %1655 = vmatprep.subr.bf16.mxu1 %v1871_v6 }
  0x13   :  { %v1656_v5 = vpack.c.bf16 %v149_v4, %v148_v3 }
  0x14   :  { %29 = vsyncpa [#allocation3], 0  ;;  %1405 = vmatprep.mubr.msk.f32.mxu1 %vm1869_vm1, %v1868_v2  ;;  %1410 = vmatprep.mubr.msk.f32.mxu0 %vm1869_vm1, %v1868_v2  ;;  %vm157_vm5 = vcmask 80896   ;;  %s2473_s28 = sld [smem:[#allocation10_spill]]  ;;  %s2474_s1 = sld [smem:[#allocation9_spill]]  ;;  %vm319_vm7 = vcmask 261120  }
  0x15   :  { %1658 = vmatpush3.bf16.msk.msra.mxu1 %vm1657_vm4, %v1656_v5  ;;  %s2475_s6 = sld [smem:[#allocation11_spill]]  ;;  %s2476_s7 = sld [smem:[#allocation12_spill]]  ;;  %v552_v36 = vld [vmem:[%s2442_s9] sm:$0xff]  ;;  %v553_v37 = vld [vmem:[%s2442_s9 + $0x8] sm:$0xff]  ;;  %v554_v38 = vld [vmem:[%s2442_s9 + $0x10] sm:$0xff] }
  0x16   :  { %1659 = vmatprep.subr.bf16.mxu1 %v1871_v6  ;;  %v1672_v39 = vpack.c.bf16 %v553_v37, %v552_v36  ;;  %v555_v40 = vld [vmem:[%s2442_s9 + $0x18] sm:$0xff]  ;;  %v556_v42 = vld [vmem:[%s2442_s9 + $0x20] sm:$0xff]  ;;  %v557_v43 = vld [vmem:[%s2442_s9 + $0x28] sm:$0xff]  ;;  %s2477_s24 = sld [smem:[#allocation7_spill]]  ;;  %s2478_s29 = sld [smem:[#allocation13_spill]] }
  0x17   :  { %v1675_v41 = vpack.c.bf16 %v555_v40, %v554_v38  ;;  %v1678_v44 = vpack.c.bf16 %v557_v43, %v556_v42  ;;  %v558_v45 = vld [vmem:[%s2442_s9 + $0x30] sm:$0xff]  ;;  %v559_v46 = vld [vmem:[%s2442_s9 + $0x38] sm:$0xff]  ;;  %v560_v48 = vld [vmem:[%s2442_s9 + $0x40] sm:$0xff] }
  0x18   :  { %v1681_v47 = vpack.c.bf16 %v559_v46, %v558_v45  ;;  %v561_v49 = vld [vmem:[%s2442_s9 + $0x48] sm:$0xff]  ;;  %v562_v51 = vld [vmem:[%s2442_s9 + $0x50] sm:$0xff]  ;;  %v563_v52 = vld [vmem:[%s2442_s9 + $0x58] sm:$0xff] }
  0x19   :  { %v1684_v50 = vpack.c.bf16 %v561_v49, %v560_v48  ;;  %v1687_v53 = vpack.c.bf16 %v563_v52, %v562_v51  ;;  %v564_v54 = vld [vmem:[%s2442_s9 + $0x60] sm:$0xff]  ;;  %v565_v55 = vld [vmem:[%s2442_s9 + $0x68] sm:$0xff]  ;;  %v650_v60 = vld [vmem:[%s2444_s11 + $0x10] sm:$0xff] }
  0x1a   :  { %v308_v9 = vld [vmem:[%s2473_s28] sm:$0xff]  ;;  %v309_v10 = vld [vmem:[%s2473_s28 + $0x8] sm:$0xff]  ;;  %v310_v11 = vld [vmem:[%s2473_s28 + $0x10] sm:$0xff]  ;;  %v1690_v56 = vpack.c.bf16 %v565_v55, %v564_v54 }
  0x1b   :  { %v1660_v12 = vpack.c.bf16 %v309_v10, %v308_v9  ;;  %v311_v13 = vld [vmem:[%s2473_s28 + $0x18] sm:$0xff]  ;;  %v1252_v15 = vld [vmem:[%s2474_s1] ss:$0 sm:$0xff]  ;;  %v468_v29 = vld [vmem:[%s2476_s7 + $0x8] sm:$0xff] }
  0x1c   :  { %v1663_v14 = vpack.c.bf16 %v311_v13, %v310_v11  ;;  %v1256_v23 = vld [vmem:[%s2475_s6] ss:$0 sm:$0xff]  ;;  %v469_v33 = vld [vmem:[%s2476_s7 + $0x10] sm:$0xff]  ;;  %v470_v34 = vld [vmem:[%s2476_s7 + $0x18] sm:$0xff] }
  0x1d   :  { %v467_v28 = vld [vmem:[%s2476_s7] sm:$0xff]  ;;  %v1669_v35 = vpack.c.bf16 %v470_v34, %v469_v33  ;;  %v649_v58 = vld [vmem:[%s2444_s11 + $0x8] sm:$0xff]  ;;  %v651_v61 = vld [vmem:[%s2444_s11 + $0x18] sm:$0xff] }
  0x1e   :  { %v1666_v32 = vpack.c.bf16 %v468_v29, %v467_v28  ;;  %v648_v57 = vld [vmem:[%s2444_s11] sm:$0xff]  ;;  %v1699_v0 = vpack.c.bf16 %v651_v61, %v650_v60  ;;  %v653_v3 = vld [vmem:[%s2444_s11 + $0x28] sm:$0xff]  ;;  %v654_v5 = vld [vmem:[%s2444_s11 + $0x30] sm:$0xff] }
  0x1f   :  { %v1696_v59 = vpack.c.bf16 %v649_v58, %v648_v57  ;;  %v656_v9 = vld [vmem:[%s2444_s11 + $0x40] sm:$0xff]  ;;  %v657_v10 = vld [vmem:[%s2444_s11 + $0x48] sm:$0xff]  ;;  %v659_v13 = vld [vmem:[%s2444_s11 + $0x58] sm:$0xff] }
  0x20   :  { %v1708_v11 = vpack.c.bf16 %v657_v10, %v656_v9  ;;  %v744_v28 = vld [vmem:[%s2446_s13] sm:$0xff]  ;;  %v745_v29 = vld [vmem:[%s2446_s13 + $0x8] sm:$0xff]  ;;  %v750_v36 = vld [vmem:[%s2446_s13 + $0x30] sm:$0xff] }
  0x21   :  { %v749_v34 = vld [vmem:[%s2446_s13 + $0x28] sm:$0xff]  ;;  %v751_v37 = vld [vmem:[%s2446_s13 + $0x38] sm:$0xff]  ;;  %v754_v42 = vld [vmem:[%s2446_s13 + $0x50] sm:$0xff] }
  0x22   :  { %v1729_v38 = vpack.c.bf16 %v751_v37, %v750_v36  ;;  %v753_v40 = vld [vmem:[%s2446_s13 + $0x48] sm:$0xff]  ;;  %v755_v43 = vld [vmem:[%s2446_s13 + $0x58] sm:$0xff]  ;;  %v756_v45 = vld [vmem:[%s2446_s13 + $0x60] sm:$0xff] }
  0x23   :  { %v757_v46 = vld [vmem:[%s2446_s13 + $0x68] sm:$0xff]  ;;  %v1261_v48 = vld [vmem:[%s2443_s10] ss:$0 sm:$0xff]  ;;  %v923_v57 = vld [vmem:[%s2448_s15 + $0x10] sm:$0xff] }
  0x24   :  { %v921_v52 = vld [vmem:[%s2448_s15] sm:$0xff]  ;;  %v924_v58 = vld [vmem:[%s2448_s15 + $0x18] sm:$0xff]  ;;  %v1031_v36 = vld [vmem:[%s2450_s17 + $0x30] sm:$0xff] }
  0x25   :  { %v1747_v60 = vpack.c.bf16 %v924_v58, %v923_v57  ;;  %v925_v61 = vld [vmem:[%s2448_s15 + $0x20] sm:$0xff]  ;;  %v932_v9 = vld [vmem:[%s2448_s15 + $0x58] sm:$0xff]  ;;  %v1134_v57 = vld [vmem:[%s2452_s19 + $0x28] sm:$0xff] }
  0x26   :  { %v1032_v37 = vld [vmem:[%s2450_s17 + $0x38] sm:$0xff] }
  0xe5   :  { %v144_v7 = vpop.f32.mrb[0].mxu1 }
  0xe6   :  { %v1400_v8 = vpop.f32.mrb[1].mxu1  ;;  %1406 = vmatmul.mubr.msk.f32.vlgmr.msra.gmra.mrb[2].mxu1 %vm157_vm5, %v144_v7  ;;  %v655_v7 = vld [vmem:[%s2444_s11 + $0x38] sm:$0xff] }
  0xe7   :  { %1421 = vmatprep.mubr.msk.f32.mxu1 %vm1869_vm1, %v1868_v2  ;;  %1661 = vmatpush3.bf16.msra.mxu1 %v1660_v12  ;;  %v1705_v8 = vpack.c.bf16 %v655_v7, %v654_v5  ;;  %v658_v12 = vld [vmem:[%s2444_s11 + $0x50] sm:$0xff]  ;;  %v930_v5 = vld [vmem:[%s2448_s15 + $0x48] sm:$0xff] }
  0xe8   :  { %1662 = vmatprep.subr.bf16.mxu1 %v1871_v6 }
  0xeb   :  { %1664 = vmatpush3.bf16.msra.mxu1 %v1663_v14  ;;  %v1711_v14 = vpack.c.bf16 %v659_v13, %v658_v12  ;;  %v934_v12 = vld [vmem:[%s2448_s15 + $0x68] sm:$0xff] }
  0xec   :  { %1671 = vmatprep.subr.bf16.mxu1 %v1871_v6 }
 0x1b9   :  { %v231_v16 = vpop.f32.mrb[2].mxu1 }
 0x1ba   :  { %v232_v17 = vadd.f32 %v1252_v15, %v231_v16  ;;  %v1407_v18 = vpop.f32.mrb[3].mxu1  ;;  %v660_v15 = vld [vmem:[%s2444_s11 + $0x60] sm:$0xff]  ;;  %v661_v16 = vld [vmem:[%s2444_s11 + $0x68] sm:$0xff] }
 0x1bb   :  { %v566_v18 = vld [vmem:[%s2442_s9 + $0x70] sm:$0xff] }
 0x1bc   :  { %vm235_vm6 = vcmp.gt.f32.partialorder %v232_v17, 0.0  ;;  %v236_v19 = vmul.f32 0.1, %v232_v17 }
 0x1be   :  { %v237_v20 = vsel %vm235_vm6, %v232_v17, %v236_v19  ;;  %v1714_v17 = vpack.c.bf16 %v661_v16, %v660_v15  ;;  %v567_v19 = vld [vmem:[%s2442_s9 + $0x78] sm:$0xff]  ;;  %v935_v16 = vld [vmem:[%s2448_s15 + $0x70] sm:$0xff] }
 0x1bf   :  { %1409 = vmatpush3.msra.mxu0 %v237_v20  ;;  %v759_v15 = vld [vmem:[%s2446_s13 + $0x78] sm:$0xff] }
 0x1c0   :  { %1411 = vmatmul.mubr.msk.f32.vlgmr.msra.gmra.mrb[0].mxu0 %vm74_vm0, %v1999_v1  ;;  %1424 = vmatprep.subr.mxu0 %v1868_v2 }
 0x1c1   :  { %1426 = vmatprep.mubr.msk.f32.mxu0 %vm1869_vm1, %v1868_v2 }
 0x293   :  { %v304_v21 = vpop.f32.mrb[0].mxu0 }
 0x294   :  { %v1412_v22 = vpop.f32.mrb[1].mxu0  ;;  %1422 = vmatmul.mubr.msk.f32.vlgmr.msra.gmra.mrb[4].mxu1 %vm319_vm7, %v304_v21  ;;  %v662_v21 = vld [vmem:[%s2444_s11 + $0x70] sm:$0xff] }
 0x295   :  { %1472 = vmatprep.mubr.msk.f32.mxu1 %vm1869_vm1, %v1868_v2  ;;  %1673 = vmatpush3.bf16.msra.mxu1 %v1672_v39  ;;  %v663_v22 = vld [vmem:[%s2444_s11 + $0x78] sm:$0xff]  ;;  %v752_v39 = vld [vmem:[%s2446_s13 + $0x40] sm:$0xff] }
 0x296   :  { %1674 = vmatprep.subr.bf16.mxu1 %v1871_v6 }
 0x299   :  { %1676 = vmatpush3.bf16.msra.mxu1 %v1675_v41  ;;  %v1732_v41 = vpack.c.bf16 %v753_v40, %v752_v39  ;;  %v1033_v39 = vld [vmem:[%s2450_s17 + $0x40] sm:$0xff]  ;;  %v1034_v40 = vld [vmem:[%s2450_s17 + $0x48] sm:$0xff] }
 0x29a   :  { %1677 = vmatprep.subr.bf16.mxu1 %v1871_v6 }
 0x29d   :  { %1679 = vmatpush3.bf16.msra.mxu1 %v1678_v44  ;;  %v1735_v44 = vpack.c.bf16 %v755_v43, %v754_v42  ;;  %v1035_v42 = vld [vmem:[%s2450_s17 + $0x50] sm:$0xff]  ;;  %v1036_v43 = vld [vmem:[%s2450_s17 + $0x58] sm:$0xff] }
 0x29e   :  { %1680 = vmatprep.subr.bf16.mxu1 %v1871_v6 }
 0x2a1   :  { %1682 = vmatpush3.bf16.msra.mxu1 %v1681_v47  ;;  %v1738_v47 = vpack.c.bf16 %v757_v46, %v756_v45  ;;  %v1037_v45 = vld [vmem:[%s2450_s17 + $0x60] sm:$0xff]  ;;  %v1038_v46 = vld [vmem:[%s2450_s17 + $0x68] sm:$0xff] }
 0x2a2   :  { %1683 = vmatprep.subr.bf16.mxu1 %v1871_v6 }
 0x2a5   :  { %1685 = vmatpush3.bf16.msra.mxu1 %v1684_v50 }
 0x2a6   :  { %1686 = vmatprep.subr.bf16.mxu1 %v1871_v6 }
 0x2a9   :  { %1688 = vmatpush3.bf16.msra.mxu1 %v1687_v53  ;;  %v922_v53 = vld [vmem:[%s2448_s15 + $0x8] sm:$0xff] }
 0x2aa   :  { %1689 = vmatprep.subr.bf16.mxu1 %v1871_v6  ;;  %v1743_v55 = vpack.c.bf16 %v922_v53, %v921_v52  ;;  %v1130_v52 = vld [vmem:[%s2452_s19 + $0x8] sm:$0xff]  ;;  %v1131_v53 = vld [vmem:[%s2452_s19 + $0x10] sm:$0xff] }
 0x2ad   :  { %1691 = vmatpush3.bf16.msra.mxu1 %v1690_v56 }
 0x2ae   :  { %1692 = vmatprep.subr.bf16.mxu1 %v1871_v6 }
 0x367   :  { %v389_v24 = vpop.f32.mrb[4].mxu1 }
 0x368   :  { %v390_v25 = vadd.f32 %v1256_v23, %v389_v24  ;;  %v1423_v26 = vpop.f32.mrb[5].mxu1  ;;  %v1717_v23 = vpack.c.bf16 %v663_v22, %v662_v21  ;;  %v1259_v24 = vld [vmem:[%s2441_s8] ss:$0 sm:$0xff]  ;;  %v1026_v21 = vld [vmem:[%s2450_s17 + $0x8] sm:$0xff] }
 0x36a   :  { %vm393_vm8 = vcmp.gt.f32.partialorder %v390_v25, 0.0  ;;  %v394_v27 = vmul.f32 0.1, %v390_v25 }
 0x36c   :  { %v395_v30 = vsel %vm393_vm8, %v390_v25, %v394_v27 }
 0x36d   :  { %v396_v31 = vadd.f32 %v395_v30, %v237_v20  ;;  %v1693_v20 = vpack.c.bf16 %v567_v19, %v566_v18  ;;  %v1720_v30 = vpack.c.bf16 %v745_v29, %v744_v28  ;;  %v936_v18 = vld [vmem:[%s2448_s15 + $0x78] sm:$0xff] }
 0x36e   :  { %v1771_v19 = vpack.c.bf16 %v936_v18, %v935_v16  ;;  %v1028_v28 = vld [vmem:[%s2450_s17 + $0x18] sm:$0xff] }
 0x36f   :  { %1425 = vmatpush3.msra.mxu0 %v396_v31  ;;  %1694 = vmatpush3.bf16.msra.mxu1 %v1693_v20  ;;  %v746_v31 = vld [vmem:[%s2446_s13 + $0x10] sm:$0xff]  ;;  %v1025_v20 = vld [vmem:[%s2450_s17] sm:$0xff] }
 0x370   :  { %1427 = vmatmul.mubr.msk.f32.vlgmr.msra.gmra.mrb[2].mxu0 %vm74_vm0, %v1999_v1  ;;  %1665 = vmatprep.subr.bf16.mxu0 %v1871_v6  ;;  %v652_v1 = vld [vmem:[%s2444_s11 + $0x20] sm:$0xff]  ;;  %v1775_v22 = vpack.c.bf16 %v1026_v21, %v1025_v20  ;;  %v1142_v20 = vld [vmem:[%s2452_s19 + $0x68] sm:$0xff] }
 0x371   :  { %1667 = vmatpush3.bf16.msra.mxu0 %v1666_v32  ;;  %1437 = vmatprep.mubr.msk.f32.mxu0 %vm1869_vm1, %v1868_v2  ;;  %v1702_v4 = vpack.c.bf16 %v653_v3, %v652_v1  ;;  %v747_v32 = vld [vmem:[%s2446_s13 + $0x18] sm:$0xff] }
 0x372   :  { %1668 = vmatprep.subr.bf16.mxu0 %v1871_v6  ;;  %1719 = vmatprep.subr.bf16.mxu1 %v1871_v6  ;;  %v1723_v33 = vpack.c.bf16 %v747_v32, %v746_v31  ;;  %v928_v1 = vld [vmem:[%s2448_s15 + $0x38] sm:$0xff] }
 0x375   :  { %1670 = vmatpush3.bf16.msra.mxu0 %v1669_v35 }
 0x376   :  { %1695 = vmatprep.subr.bf16.mxu0 %v1871_v6 }
 0x443   :  { %v463_v62 = vpop.f32.mrb[2].mxu0 }
 0x444   :  { %1438 = vmatmul.mubr.msk.f32.vlgmr.msra.gmra.mrb[4].mxu0 %vm319_vm7, %v463_v62  ;;  %v1428_v63 = vpop.f32.mrb[3].mxu0  ;;  %v926_v62 = vld [vmem:[%s2448_s15 + $0x28] sm:$0xff] }
 0x445   :  { %1697 = vmatpush3.bf16.msra.mxu0 %v1696_v59  ;;  %1507 = vmatprep.mubr.msk.f32.mxu0 %vm1869_vm1, %v1868_v2  ;;  %v839_v59 = vld [vmem:[%s2477_s24 + $0x8] sm:$0xff]  ;;  %v1751_v63 = vpack.c.bf16 %v926_v62, %v925_v61  ;;  %v1137_v62 = vld [vmem:[%s2452_s19 + $0x40] sm:$0xff] }
 0x446   :  { %1698 = vmatprep.subr.bf16.mxu0 %v1871_v6 }
 0x449   :  { %1700 = vmatpush3.bf16.msra.mxu0 %v1699_v0  ;;  %v927_v0 = vld [vmem:[%s2448_s15 + $0x30] sm:$0xff] }
 0x44a   :  { %1701 = vmatprep.subr.bf16.mxu0 %v1871_v6  ;;  %v1755_v3 = vpack.c.bf16 %v928_v1, %v927_v0  ;;  %v1139_v1 = vld [vmem:[%s2452_s19 + $0x50] sm:$0xff] }
 0x44d   :  { %1703 = vmatpush3.bf16.msra.mxu0 %v1702_v4  ;;  %v929_v4 = vld [vmem:[%s2448_s15 + $0x40] sm:$0xff] }
 0x44e   :  { %1704 = vmatprep.subr.bf16.mxu0 %v1871_v6  ;;  %v1759_v7 = vpack.c.bf16 %v930_v5, %v929_v4  ;;  %v1263_v5 = vld [vmem:[%s2447_s14] ss:$0 sm:$0xff] }
 0x451   :  { %1706 = vmatpush3.bf16.msra.mxu0 %v1705_v8  ;;  %v931_v8 = vld [vmem:[%s2448_s15 + $0x50] sm:$0xff] }
 0x452   :  { %1707 = vmatprep.subr.bf16.mxu0 %v1871_v6  ;;  %v1763_v10 = vpack.c.bf16 %v932_v9, %v931_v8 }
 0x455   :  { %1709 = vmatpush3.bf16.msra.mxu0 %v1708_v11  ;;  %v933_v11 = vld [vmem:[%s2448_s15 + $0x60] sm:$0xff] }
 0x456   :  { %1710 = vmatprep.subr.bf16.mxu0 %v1871_v6  ;;  %v1767_v13 = vpack.c.bf16 %v934_v12, %v933_v11 }
 0x459   :  { %1712 = vmatpush3.bf16.msra.mxu0 %v1711_v14  ;;  %v758_v14 = vld [vmem:[%s2446_s13 + $0x70] sm:$0xff] }
 0x45a   :  { %1713 = vmatprep.subr.bf16.mxu0 %v1871_v6 }
 0x45d   :  { %1715 = vmatpush3.bf16.msra.mxu0 %v1714_v17  ;;  %v1741_v17 = vpack.c.bf16 %v759_v15, %v758_v14 }
 0x45e   :  { %1716 = vmatprep.subr.bf16.mxu0 %v1871_v6 }
 0x461   :  { %1718 = vmatpush3.bf16.msra.mxu0 %v1717_v23  ;;  %v1262_v23 = vld [vmem:[%s2445_s12] ss:$0 sm:$0xff] }
 0x517   :  { %v547_v25 = vpop.f32.mrb[4].mxu0 }
 0x518   :  { %v548_v26 = vadd.f32 %v1259_v24, %v547_v25  ;;  %v1439_v27 = vpop.f32.mrb[5].mxu0 }
 0x519   :  { %v1027_v27 = vld [vmem:[%s2450_s17 + $0x10] sm:$0xff] }
 0x51a   :  { %551 = vst [vmem:[#allocation2] sm:$0xff] %v548_v26  ;;  %1473 = vmatmul.mubr.f32.vlgmr.msra.gmra.mrb[6].mxu1 %v548_v26  ;;  %1545 = vmatprep.subr.mxu0 %v548_v26  ;;  %v1779_v31 = vpack.c.bf16 %v1028_v28, %v1027_v27 }
 0x51b   :  { %1542 = vmatprep.mubr.msk.f32.mxu1 %vm1869_vm1, %v1868_v2  ;;  %1721 = vmatpush3.bf16.msra.mxu1 %v1720_v30  ;;  %v748_v2 = vld [vmem:[%s2446_s13 + $0x20] sm:$0xff] }
 0x51c   :  { %1722 = vmatprep.subr.bf16.mxu1 %v1871_v6  ;;  %v1726_v35 = vpack.c.bf16 %v749_v34, %v748_v2  ;;  %v1029_v2 = vld [vmem:[%s2450_s17 + $0x20] sm:$0xff]  ;;  %v1030_v34 = vld [vmem:[%s2450_s17 + $0x28] sm:$0xff] }
 0x51f   :  { %1724 = vmatpush3.bf16.msra.mxu1 %v1723_v33 }
 0x520   :  { %1725 = vmatprep.subr.bf16.mxu1 %v1871_v6 }
 0x523   :  { %1727 = vmatpush3.bf16.msra.mxu1 %v1726_v35  ;;  %v1783_v35 = vpack.c.bf16 %v1030_v34, %v1029_v2 }
 0x524   :  { %1728 = vmatprep.subr.bf16.mxu1 %v1871_v6 }
 0x527   :  { %1730 = vmatpush3.bf16.msra.mxu1 %v1729_v38  ;;  %v1787_v38 = vpack.c.bf16 %v1032_v37, %v1031_v36 }
 0x528   :  { %1731 = vmatprep.subr.bf16.mxu1 %v1871_v6 }
 0x52b   :  { %1733 = vmatpush3.bf16.msra.mxu1 %v1732_v41  ;;  %v1791_v41 = vpack.c.bf16 %v1034_v40, %v1033_v39 }
 0x52c   :  { %1734 = vmatprep.subr.bf16.mxu1 %v1871_v6 }
 0x52f   :  { %1736 = vmatpush3.bf16.msra.mxu1 %v1735_v44  ;;  %v1795_v44 = vpack.c.bf16 %v1036_v43, %v1035_v42 }
 0x530   :  { %1737 = vmatprep.subr.bf16.mxu1 %v1871_v6 }
 0x533   :  { %1739 = vmatpush3.bf16.msra.mxu1 %v1738_v47  ;;  %v1799_v47 = vpack.c.bf16 %v1038_v46, %v1037_v45 }
 0x534   :  { %1740 = vmatprep.subr.bf16.mxu1 %v1871_v6  ;;  %v838_v6 = vld [vmem:[%s2477_s24] sm:$0xff] }
 0x537   :  { %1742 = vmatpush3.bf16.msra.mxu1 %v1741_v17 }
 0x538   :  { %1776 = vmatprep.subr.bf16.mxu1 %v1775_v22 }
 0x5ed   :  { %v641_v49 = vpop.f32.mrb[6].mxu1 }
 0x5ee   :  { %v642_v50 = vadd.f32 %v1261_v48, %v641_v49  ;;  %v1474_v51 = vpop.f32.mrb[7].mxu1  ;;  %v1039_v48 = vld [vmem:[%s2450_s17 + $0x70] sm:$0xff]  ;;  %v1040_v49 = vld [vmem:[%s2450_s17 + $0x78] sm:$0xff] }
 0x5ef   :  { %v1129_v51 = vld [vmem:[%s2452_s19] sm:$0xff] }
 0x5f0   :  { %vm645_vm9 = vcmp.gt.f32.partialorder %v642_v50, 0.0  ;;  %v646_v54 = vmul.f32 0.1, %v642_v50 }
 0x5f2   :  { %v647_v56 = vsel %vm645_vm9, %v642_v50, %v646_v54  ;;  %v1803_v50 = vpack.c.bf16 %v1040_v49, %v1039_v48  ;;  %v1807_v54 = vpack.c.bf16 %v1130_v52, %v1129_v51 }
 0x5f3   :  { %1508 = vmatmul.mubr.f32.vlgmr.msra.gmra.mrb[6].mxu0 %v647_v56  ;;  %v1133_v56 = vld [vmem:[%s2452_s19 + $0x20] sm:$0xff] }
 0x5f4   :  { %1546 = vmatpush3.msra.mxu0 %v548_v26  ;;  %1547 = vmatprep.mubr.msk.f32.mxu0 %vm74_vm0, %v838_v6  ;;  %v1132_v6 = vld [vmem:[%s2452_s19 + $0x18] sm:$0xff]  ;;  %v1815_v58 = vpack.c.bf16 %v1134_v57, %v1133_v56 }
 0x5f5   :  { %1744 = vmatprep.subr.bf16.mxu0 %v1743_v55 }
 0x5f7   :  { %1548 = vmatmul.mubr.msk.f32.vlgmr.msra.gmra.mrb[8].mxu0 %vm74_vm0, %v839_v59  ;;  %v1135_v59 = vld [vmem:[%s2452_s19 + $0x30] sm:$0xff] }
 0x5f8   :  { %1746 = vmatpush3.bf16.msra.mxu0 %v1743_v55  ;;  %v1811_v55 = vpack.c.bf16 %v1132_v6, %v1131_v53 }
 0x5f9   :  { %1748 = vmatprep.subr.bf16.mxu0 %v1747_v60 }
 0x5fc   :  { %1750 = vmatpush3.bf16.msra.mxu0 %v1747_v60  ;;  %v1136_v60 = vld [vmem:[%s2452_s19 + $0x38] sm:$0xff] }
 0x5fd   :  { %1752 = vmatprep.subr.bf16.mxu0 %v1751_v63  ;;  %v1819_v61 = vpack.c.bf16 %v1136_v60, %v1135_v59 }
 0x600   :  { %1754 = vmatpush3.bf16.msra.mxu0 %v1751_v63  ;;  %v1138_v63 = vld [vmem:[%s2452_s19 + $0x48] sm:$0xff] }
 0x601   :  { %1756 = vmatprep.subr.bf16.mxu0 %v1755_v3  ;;  %v1823_v0 = vpack.c.bf16 %v1138_v63, %v1137_v62 }
 0x604   :  { %1758 = vmatpush3.bf16.msra.mxu0 %v1755_v3  ;;  %v1140_v3 = vld [vmem:[%s2452_s19 + $0x58] sm:$0xff] }
 0x605   :  { %1760 = vmatprep.subr.bf16.mxu0 %v1759_v7  ;;  %v1827_v4 = vpack.c.bf16 %v1140_v3, %v1139_v1 }
 0x608   :  { %1762 = vmatpush3.bf16.msra.mxu0 %v1759_v7  ;;  %v1266_v7 = vld [vmem:[%s2449_s16] ss:$0 sm:$0xff] }
 0x609   :  { %1764 = vmatprep.subr.bf16.mxu0 %v1763_v10 }
 0x60c   :  { %1766 = vmatpush3.bf16.msra.mxu0 %v1763_v10 }
 0x60d   :  { %1768 = vmatprep.subr.bf16.mxu0 %v1767_v13 }
 0x610   :  { %1770 = vmatpush3.bf16.msra.mxu0 %v1767_v13 }
 0x611   :  { %1772 = vmatprep.subr.bf16.mxu0 %v1771_v19 }
 0x614   :  { %1774 = vmatpush3.bf16.msra.mxu0 %v1771_v19  ;;  %v1141_v19 = vld [vmem:[%s2452_s19 + $0x60] sm:$0xff] }
 0x615   :  { %1808 = vmatprep.subr.bf16.mxu0 %v1807_v54  ;;  %v1831_v21 = vpack.c.bf16 %v1142_v20, %v1141_v19 }
 0x6c6   :  { %v737_v24 = vpop.f32.mrb[6].mxu0 }
 0x6c7   :  { %v738_v25 = vadd.f32 %v1262_v23, %v737_v24  ;;  %v1509_v26 = vpop.f32.mrb[7].mxu0  ;;  %v1144_v23 = vld [vmem:[%s2452_s19 + $0x78] sm:$0xff] }
 0x6c9   :  { %vm741_vm10 = vcmp.gt.f32.partialorder %v738_v25, 0.0  ;;  %v742_v29 = vmul.f32 0.1, %v738_v25 }
 0x6ca   :  { %v1549_v30 = vpop.f32.mrb[8].mxu0 }
 0x6cb   :  { %v912_v32 = vpop.f32.mrb[9].mxu0  ;;  %v743_v33 = vsel %vm741_vm10, %v738_v25, %v742_v29  ;;  %v1267_v25 = vld [vmem:[%s2478_s29] ss:$0 sm:$0xff] }
 0x6cc   :  { %1543 = vmatmul.mubr.f32.vlgmr.msra.gmra.mrb[8].mxu1 %v743_v33  ;;  %1582 = vmatprep.mubr.f32.mxu0 %v912_v32 }
 0x6cd   :  { %1583 = vmatmul.mubr.f32.vlgmr.msra.gmra.mrb[10].mxu0 %v1549_v30  ;;  %1778 = vmatpush3.bf16.msra.mxu1 %v1775_v22  ;;  %v1143_v22 = vld [vmem:[%s2452_s19 + $0x70] sm:$0xff]  ;;  %s1872_s19 = smov [#allocation2]  }
 0x6ce   :  { %1780 = vmatprep.subr.bf16.mxu1 %v1779_v31  ;;  %1810 = vmatpush3.bf16.msra.mxu0 %v1807_v54  ;;  %v1835_v24 = vpack.c.bf16 %v1144_v23, %v1143_v22  ;;  %s1235_s3 = sshll.u32 %s1872_s19, 4  ;;  %s1236_s3 = int_to_ptr.vmem [resolvable:$true] %s1235_s3 }
 0x6cf   :  { %1812 = vmatprep.subr.bf16.mxu0 %v1811_v55  ;;  %s1844_s0 = scalar_lea.vmem %s1236_s3, 128  ;;  %p1849_p1 = scmp.lt.s32.totalorder %s1236_s3, %s1236_s3 }
 0x6d0   :  { %p1845_p0 = scmp.ne.s32.totalorder %s1236_s3, %s1844_s0  ;;  %p1850_p2 = scmp.lt.s32.totalorder %s1844_s0, %s1844_s0 }
 0x6d1   :  { %1782 = vmatpush3.bf16.msra.mxu1 %v1779_v31 }
 0x6d2   :  { %1784 = vmatprep.subr.bf16.mxu1 %v1783_v35  ;;  %1814 = vmatpush3.bf16.msra.mxu0 %v1811_v55  ;;  %p1851_p3 = por %p1850_p2, %p1849_p1 }
 0x6d3   :  { %1816 = vmatprep.subr.bf16.mxu0 %v1815_v58 }
 0x6d4   :  { %p1852_p4 = pnand %p1851_p3, %p1845_p0 }
 0x6d5   :  { %1786 = vmatpush3.bf16.msra.mxu1 %v1783_v35 }
 0x6d6   :  { %1788 = vmatprep.subr.bf16.mxu1 %v1787_v38  ;;  %1818 = vmatpush3.bf16.msra.mxu0 %v1815_v58 }
 0x6d7   :  { %1820 = vmatprep.subr.bf16.mxu0 %v1819_v61 }
 0x6d9   :  { %1790 = vmatpush3.bf16.msra.mxu1 %v1787_v38 }
 0x6da   :  { %1792 = vmatprep.subr.bf16.mxu1 %v1791_v41  ;;  %1822 = vmatpush3.bf16.msra.mxu0 %v1819_v61 }
 0x6db   :  { %1824 = vmatprep.subr.bf16.mxu0 %v1823_v0 }
 0x6dd   :  { %1794 = vmatpush3.bf16.msra.mxu1 %v1791_v41 }
 0x6de   :  { %1796 = vmatprep.subr.bf16.mxu1 %v1795_v44  ;;  %1826 = vmatpush3.bf16.msra.mxu0 %v1823_v0 }
 0x6df   :  { %1828 = vmatprep.subr.bf16.mxu0 %v1827_v4 }
 0x6e1   :  { %1798 = vmatpush3.bf16.msra.mxu1 %v1795_v44 }
 0x6e2   :  { %1800 = vmatprep.subr.bf16.mxu1 %v1799_v47  ;;  %1830 = vmatpush3.bf16.msra.mxu0 %v1827_v4 }
 0x6e3   :  { %1832 = vmatprep.subr.bf16.mxu0 %v1831_v21 }
 0x6e5   :  { %1802 = vmatpush3.bf16.msra.mxu1 %v1799_v47 }
 0x6e6   :  { %1804 = vmatprep.subr.bf16.mxu1 %v1803_v50  ;;  %1834 = vmatpush3.bf16.msra.mxu0 %v1831_v21 }
 0x6e7   :  { %1836 = vmatprep.subr.bf16.mxu0 %v1835_v24 }
 0x6e9   :  { %1806 = vmatpush3.bf16.msra.mxu1 %v1803_v50 }
 0x6ea   :  { %1838 = vmatpush3.bf16.msra.mxu0 %v1835_v24 }
 0x79f   :  { %v833_v8 = vpop.f32.mrb[8].mxu1 }
 0x7a0   :  { %v834_v9 = vadd.f32 %v1263_v5, %v833_v8  ;;  %v1544_v10 = vpop.f32.mrb[9].mxu1  ;;  %v1584_v11 = vpop.f32.mrb[10].mxu0 }
 0x7a1   :  { %v1016_v12 = vadd.f32 %v1584_v11, %v1266_v7  ;;  %v1010_v13 = vpop.f32.mrb[11].mxu0 }
 0x7a2   :  { %837 = vst [vmem:[%s2455_s22] sm:$0xff] %v834_v9  ;;  %v1011_v14 = vadd.f32 %v1266_v7, %v1010_v13 }
 0x7a3   :  { %v1022_v15 = vmul.f32 0.1, %v1016_v12  ;;  %vm1020_vm11 = vcmp.gt.f32.partialorder %v1016_v12, 0.0 }
 0x7a4   :  { %v1021_v16 = vmul.f32 0.1, %v1011_v14  ;;  %vm1019_vm12 = vcmp.gt.f32.partialorder %v1011_v14, 0.0 }
 0x7a5   :  { %v1024_v18 = vsel %vm1020_vm11, %v1016_v12, %v1022_v15 }
 0x7a6   :  { %v1023_v17 = vsel %vm1019_vm12, %v1011_v14, %v1021_v16 }
 0x7a7   :  { %1617 = vmatprep.mubr.f32.mxu1 %v1023_v17 }
 0x7a8   :  { %1618 = vmatmul.mubr.f32.vlgmr.msra.gmra.mrb[10].mxu1 %v1024_v18 }
 0x87b   :  { %v1619_v26 = vpop.f32.mrb[10].mxu1 }
 0x87c   :  { %v1120_v27 = vadd.f32 %v1619_v26, %v1267_v25  ;;  %v1114_v28 = vpop.f32.mrb[11].mxu1 }
 0x87d   :  { %v1115_v29 = vadd.f32 %v1267_v25, %v1114_v28 }
 0x87e   :  { %v1126_v30 = vmul.f32 0.1, %v1120_v27  ;;  %vm1124_vm13 = vcmp.gt.f32.partialorder %v1120_v27, 0.0 }
 0x87f   :  { %v1125_v31 = vmul.f32 0.1, %v1115_v29  ;;  %vm1123_vm14 = vcmp.gt.f32.partialorder %v1115_v29, 0.0 }
 0x880   :  { %v1128_v33 = vsel %vm1124_vm13, %v1120_v27, %v1126_v30 }
 0x881   :  { %v1127_v32 = vsel %vm1123_vm14, %v1115_v29, %v1125_v31 }
 0x882   :  { %1652 = vmatprep.mubr.f32.mxu0 %v1127_v32 }
 0x883   :  { %1653 = vmatmul.mubr.f32.vlgmr.msra.gmra.mrb[12].mxu0 %v1128_v33 }
 0x884   :  { %1855 = shalt.err (!%p1852_p4)
}
 0x885   :  { %s1856_s30 = scalar_lea.hbm %s2454_s21, 128 }
 0x886   :  { %p1857_p5 = scmp.ne.s32.totalorder %s2454_s21, %s1856_s30  ;;  %p1860_p6 = scmp.lt.u32.totalorder %s1856_s30, %s2454_s21 }
 0x888   :  { %p1862_p7 = pnand %p1860_p6, %p1857_p5 }
 0x88a   :  { %1865 = shalt.err (!%p1862_p7)
}
 0x88b   :  { %1238 = dma.vmem_to_hbm [thread:$0]  %s1236_s3, 128, %s2454_s21, [#allocation3]   ;;  %v1268_v2 = vld [vmem:[%s2453_s20] ss:$0 sm:$0xff] }
 0x956   :  { %v1654_v34 = vpop.f32.mrb[12].mxu0 }
 0x957   :  { %v1224_v35 = vadd.f32 %v1654_v34, %v1268_v2  ;;  %v1218_v36 = vpop.f32.mrb[13].mxu0 }
 0x958   :  { %v1219_v37 = vadd.f32 %v1268_v2, %v1218_v36 }
 0x959   :  { %1228 = vst [vmem:[%s2456_s23 + $0x8] sm:$0xff] %v1224_v35 }
 0x95a   :  { %1227 = vst [vmem:[%s2456_s23] sm:$0xff] %v1219_v37 }
 0x95b   :  { %1866 = dma.done.wait [#allocation3], 128  }
 0x95c   :  { %1867 = vsyncadd [#allocation3], 4294967168 }
 0x95d   :  { %1250 = vsyncpa [#allocation3], 1 }

</bundles_post_ra>
